<compile_context>
chip_gen: v7x
topology: tpu7x:2x2x1
jax: 0.10.0
libtpu: 0.0.40
codegen_flags: <defaults>
</compile_context>

<pallas_src>
import functools

import jax
import jax.numpy as jnp
from jax.experimental import pallas as pl
from jax.experimental.pallas import tpu as pltpu

ADAIN_EPS = 1e-5


# ------------------------------ Pallas kernel -------------------------------

def _adain_kernel(c_ref, s_ref, o_ref, *, hw, shw, eps):
    # c_ref: (tr, HW) content rows, s_ref: (tr, SHW) style rows.
    # Each row is one (n, c) instance; reduce over the lane (spatial) axis.
    c = c_ref[...].astype(jnp.float32)
    s = s_ref[...].astype(jnp.float32)

    inv_hw = 1.0 / hw
    inv_hw1 = 1.0 / max(hw - 1, 1)      # guard HW == 1 (torch would NaN)
    inv_shw = 1.0 / shw
    inv_shw1 = 1.0 / max(shw - 1, 1)

    c_mean = jnp.sum(c, axis=-1, keepdims=True) * inv_hw
    c_cent = c - c_mean
    c_var = jnp.sum(c_cent * c_cent, axis=-1, keepdims=True) * inv_hw1
    c_std = jnp.sqrt(c_var) + eps

    s_mean = jnp.sum(s, axis=-1, keepdims=True) * inv_shw
    s_cent = s - s_mean
    s_var = jnp.sum(s_cent * s_cent, axis=-1, keepdims=True) * inv_shw1
    s_std = jnp.sqrt(s_var) + eps

    # Single reciprocal on the EUP instead of a per-element divide.
    scale = s_std * pl.reciprocal(c_std, approx=True)
    o_ref[...] = (c_cent * scale + s_mean).astype(o_ref.dtype)


# ------------------------------ wrapper / tiling -----------------------------

def _choose_row_tile(rows, hw, shw, itemsize, vmem_budget=8 << 20):
    # Bytes resident per row inside one block: content in + content out + style,
    # sized with f32 (compute dtype) as the conservative bound.
    per_row = (2 * hw + shw) * max(int(itemsize), 4)
    # Sublane-aligned divisors of the fused row count.
    divs = [d for d in range(8, rows + 1, 8) if rows % d == 0]
    fitting = [d for d in divs if d * per_row <= vmem_budget]
    if fitting:
        return max(fitting)
    if divs:
        # TODO(synk): extremely large H*W would want a spatial-split two-pass
        # reduction; here we just take the smallest aligned row tile.
        return min(divs)
    return rows  # rows < 8 or no aligned divisor: full extent (always legal).


def adain(content, style, eps=ADAIN_EPS):
    # content: (N, C, H, W), style: (N, C, SH, SW)  (PyTorch NCHW layout).
    n, c, h, w = content.shape
    sn, sc, sh, sw = style.shape
    assert sn == n and sc == c, "content/style must share batch and channels"
    hw = h * w
    shw = sh * sw
    rows = n * c

    # Free views: NCHW is contiguous as (N*C, H*W); spatial -> lane axis.
    cont = content.reshape(rows, hw)
    sty = style.reshape(rows, shw)

    tr = _choose_row_tile(rows, hw, shw, content.dtype.itemsize)
    grid = (rows // tr,)

    out = pl.pallas_call(
        functools.partial(_adain_kernel, hw=hw, shw=shw, eps=eps),
        out_shape=jax.ShapeDtypeStruct((rows, hw), content.dtype),
        grid_spec=pltpu.PrefetchScalarGridSpec(
            num_scalar_prefetch=0,
            grid=grid,
            in_specs=[
                pl.BlockSpec((tr, hw), lambda i: (i, 0)),
                pl.BlockSpec((tr, shw), lambda i: (i, 0)),
            ],
            out_specs=pl.BlockSpec((tr, hw), lambda i: (i, 0)),
        ),
        compiler_params=pltpu.CompilerParams(
            dimension_semantics=("parallel",),
        ),
    )(cont, sty)
    return out.reshape(n, c, h, w)


@jax.jit
def adain_layer(content, style):
    # AdaINLayer.forward(content, style)
    return adain(content, style)


# ------------------------------ pure-JAX reference ---------------------------

def _adain_ref(content, style, eps=ADAIN_EPS):
    c_mean = jnp.mean(content, axis=(2, 3), keepdims=True)
    c_std = jnp.std(content, axis=(2, 3), keepdims=True, ddof=1) + eps
    s_mean = jnp.mean(style, axis=(2, 3), keepdims=True)
    s_std = jnp.std(style, axis=(2, 3), keepdims=True, ddof=1) + eps
    return (content - c_mean) / c_std * s_std + s_mean


# ---------------------------------- main -------------------------------------

if __name__ == "__main__":
    key = jax.random.PRNGKey(0)
    kc, ks = jax.random.split(key)
    # NCHW inputs, matching the PyTorch module's conventions.
    content = jax.random.normal(kc, (2, 8, 16, 16), jnp.float32)
    style = jax.random.normal(ks, (2, 8, 8, 8), jnp.float32) * 1.5 + 0.25

    out = adain_layer(content, style)
    out = jax.block_until_ready(out)

    assert out.shape == content.shape, out.shape
    assert bool(jnp.all(jnp.isfinite(out)))

    ref = _adain_ref(content, style)
    # Loose tolerance: pl.reciprocal(approx=True) trades ~1e-4 rel error for EUP.
    assert bool(jnp.allclose(out, ref, rtol=1e-2, atol=1e-2)), (
        float(jnp.max(jnp.abs(out - ref))))

    print("KERNEL_OK")
</pallas_src>

<mosaic_0001>
module attributes {stable_mosaic.version = 11 : i64} {
  func.func @_adain_kernel(%arg0: i32, %arg1: memref<16x256xf32, #tpu.memory_space<vmem>>, %arg2: memref<16x64xf32, #tpu.memory_space<vmem>>, %arg3: memref<16x256xf32, #tpu.memory_space<vmem>>) attributes {dimension_semantics = [#tpu.dimension_semantics<parallel>], iteration_bounds = array<i64: 1>, scalar_prefetch = 0 : i64, scratch_operands = 0 : i64, tpu.core_type = #tpu.core_type<tc>, window_params = [{transform_indices = @transform_0, window_bounds = array<i64: 16, 256>}, {transform_indices = @transform_1, window_bounds = array<i64: 16, 64>}, {transform_indices = @transform_2, window_bounds = array<i64: 16, 256>}]} {
    %c0 = arith.constant 0 : index
    %c0_0 = arith.constant 0 : index
    %0 = vector.load %arg1[%c0, %c0_0] : memref<16x256xf32, #tpu.memory_space<vmem>>, vector<16x256xf32>
    %c0_1 = arith.constant 0 : index
    %c0_2 = arith.constant 0 : index
    %1 = vector.load %arg2[%c0_1, %c0_2] : memref<16x64xf32, #tpu.memory_space<vmem>>, vector<16x64xf32>
    %cst = arith.constant dense<0.000000e+00> : vector<16xf32>
    %2 = vector.multi_reduction <add>, %0, %cst [1] : vector<16x256xf32> to vector<16xf32>
    %3 = vector.shape_cast %2 : vector<16xf32> to vector<16x1xf32>
    %cst_3 = arith.constant 3.906250e-03 : f32
    %4 = vector.broadcast %cst_3 : f32 to vector<16x1xf32>
    %5 = arith.mulf %3, %4 : vector<16x1xf32>
    %6 = vector.broadcast %5 : vector<16x1xf32> to vector<16x256xf32>
    %7 = arith.subf %0, %6 : vector<16x256xf32>
    %8 = arith.mulf %7, %7 : vector<16x256xf32>
    %cst_4 = arith.constant dense<0.000000e+00> : vector<16xf32>
    %9 = vector.multi_reduction <add>, %8, %cst_4 [1] : vector<16x256xf32> to vector<16xf32>
    %10 = vector.shape_cast %9 : vector<16xf32> to vector<16x1xf32>
    %cst_5 = arith.constant 0.00392156886 : f32
    %11 = vector.broadcast %cst_5 : f32 to vector<16x1xf32>
    %12 = arith.mulf %10, %11 : vector<16x1xf32>
    %13 = math.sqrt %12 : vector<16x1xf32>
    %cst_6 = arith.constant 9.99999974E-6 : f32
    %14 = vector.broadcast %cst_6 : f32 to vector<16x1xf32>
    %15 = arith.addf %13, %14 : vector<16x1xf32>
    %cst_7 = arith.constant dense<0.000000e+00> : vector<16xf32>
    %16 = vector.multi_reduction <add>, %1, %cst_7 [1] : vector<16x64xf32> to vector<16xf32>
    %17 = vector.shape_cast %16 : vector<16xf32> to vector<16x1xf32>
    %cst_8 = arith.constant 1.562500e-02 : f32
    %18 = vector.broadcast %cst_8 : f32 to vector<16x1xf32>
    %19 = arith.mulf %17, %18 : vector<16x1xf32>
    %20 = vector.broadcast %19 : vector<16x1xf32> to vector<16x64xf32>
    %21 = arith.subf %1, %20 : vector<16x64xf32>
    %22 = arith.mulf %21, %21 : vector<16x64xf32>
    %cst_9 = arith.constant dense<0.000000e+00> : vector<16xf32>
    %23 = vector.multi_reduction <add>, %22, %cst_9 [1] : vector<16x64xf32> to vector<16xf32>
    %24 = vector.shape_cast %23 : vector<16xf32> to vector<16x1xf32>
    %cst_10 = arith.constant 0.0158730168 : f32
    %25 = vector.broadcast %cst_10 : f32 to vector<16x1xf32>
    %26 = arith.mulf %24, %25 : vector<16x1xf32>
    %27 = math.sqrt %26 : vector<16x1xf32>
    %cst_11 = arith.constant 9.99999974E-6 : f32
    %28 = vector.broadcast %cst_11 : f32 to vector<16x1xf32>
    %29 = arith.addf %27, %28 : vector<16x1xf32>
    %30 = tpu.reciprocal %15 {approx = true} : vector<16x1xf32> -> vector<16x1xf32>
    %31 = arith.mulf %29, %30 : vector<16x1xf32>
    %32 = vector.broadcast %31 : vector<16x1xf32> to vector<16x256xf32>
    %33 = arith.mulf %7, %32 : vector<16x256xf32>
    %34 = vector.broadcast %19 : vector<16x1xf32> to vector<16x256xf32>
    %35 = arith.addf %33, %34 : vector<16x256xf32>
    %c0_12 = arith.constant 0 : index
    %c0_13 = arith.constant 0 : index
    %36 = vector.load %arg3[%c0_12, %c0_13] : memref<16x256xf32, #tpu.memory_space<vmem>>, vector<16x256xf32>
    tpu.vector_store %arg3[%c0_12, %c0_13], %35 {strides = array<i32>} : memref<16x256xf32, #tpu.memory_space<vmem>>, vector<16x256xf32>,
    return
  }
  func.func @transform_0(%arg0: i32) -> (i32, i32) {
    %c0_i32 = arith.constant 0 : i32
    %c0_i32_0 = arith.constant 0 : i32
    return %arg0, %c0_i32 : i32, i32
  }
  func.func @transform_1(%arg0: i32) -> (i32, i32) {
    %c0_i32 = arith.constant 0 : i32
    %c0_i32_0 = arith.constant 0 : i32
    return %arg0, %c0_i32 : i32, i32
  }
  func.func @transform_2(%arg0: i32) -> (i32, i32) {
    %c0_i32 = arith.constant 0 : i32
    %c0_i32_0 = arith.constant 0 : i32
    return %arg0, %c0_i32 : i32, i32
  }
}

</mosaic_0001>

<bundles_post_ra>
// kernel: adain_layer.1
= control target key start
LH: loop header
LB: loop body
LE: loop exit
PB: predicated region body
PF: predicated region fallthrough
CT: control target
= control target key end

     0   :  { %vm57_vm0 = vcmask 523264   ;;  %s205_s0 = inlined_call_operand.vmem [shape: f32[16,256], index: 0, kind: input, shape index: {}]   ;;  %s206_s1 = inlined_call_operand.vmem [shape: f32[16,64], index: 1, kind: input, shape index: {}]   ;;  %s207_s2 = inlined_call_operand.vmem [shape: f32[16,256], index: 2, kind: output, shape index: {}]  }
   0x1   :  { %v11_v0 = vld [vmem:[%s205_s0] sm:$0xff]  ;;  %v12_v1 = vld [vmem:[%s205_s0 + $0x8] sm:$0xff]  ;;  %v13_v2 = vld [vmem:[%s205_s0 + $0x10] sm:$0xff] }
   0x2   :  { %v17_v3 = vadd.f32 %v12_v1, %v11_v0  ;;  %v14_v4 = vld [vmem:[%s205_s0 + $0x18] sm:$0xff]  ;;  %v15_v5 = vld [vmem:[%s206_s1] sm:$0xff]  ;;  %v16_v6 = vld [vmem:[%s206_s1 + $0x8] sm:$0xff] }
   0x3   :  { %v58_v7 = vsel %vm57_vm0, %v15_v5, 0.0  ;;  %v20_v8 = vadd.f32 %v14_v4, %v13_v2  ;;  %v61_v9 = vsel %vm57_vm0, %v16_v6, 0.0 }
   0x4   :  { %18 = vadd.xlane.f32.xlu0 %v17_v3  ;;  %59 = vadd.xlane.f32.xlu1 %v58_v7 }
   0x8   :  { %21 = vadd.xlane.f32.xlu0 %v20_v8  ;;  %62 = vadd.xlane.f32.xlu1 %v61_v9 }
  0x91   :  { %v19_v10 = vpop.xlane.xlu0 %18  ;;  %v60_v11 = vpop.xlane.xlu1 %59 }
  0x92   :  { %v23_v12 = vmul.f32 0.00390625, %v19_v10  ;;  %v161_v13 = vmul.f32 0.015625, %v60_v11 }
  0x94   :  { %v163_v14 = vsub.f32 %v11_v0, %v23_v12  ;;  %v165_v15 = vsub.f32 %v12_v1, %v23_v12  ;;  %v66_v16 = vsub.f32 %v15_v5, %v161_v13 }
  0x95   :  { %v22_v17 = vpop.xlane.xlu0 %21  ;;  %v63_v18 = vpop.xlane.xlu1 %62 }
  0x96   :  { %v24_v19 = vmul.f32 0.00390625, %v22_v17  ;;  %v168_v20 = vmul.f32 0.015625, %v63_v18  ;;  %v29_v21 = vmul.f32 %v163_v14, %v163_v14  ;;  %v30_v22 = vmul.f32 %v165_v15, %v165_v15 }
  0x97   :  { %v68_v23 = vmul.f32 %v66_v16, %v66_v16 }
  0x98   :  { %v174_v24 = vsub.f32 %v13_v2, %v24_v19  ;;  %v176_v25 = vsub.f32 %v14_v4, %v24_v19  ;;  %v33_v26 = vadd.f32 %v30_v22, %v29_v21  ;;  %v67_v27 = vsub.f32 %v16_v6, %v168_v20 }
  0x99   :  { %v70_v30 = vsel %vm57_vm0, %v68_v23, 0.0 }
  0x9a   :  { %34 = vadd.xlane.f32.xlu0 %v33_v26  ;;  %v31_v28 = vmul.f32 %v174_v24, %v174_v24  ;;  %v32_v29 = vmul.f32 %v176_v25, %v176_v25  ;;  %v69_v31 = vmul.f32 %v67_v27, %v67_v27 }
  0x9c   :  { %v36_v32 = vadd.f32 %v32_v29, %v31_v28  ;;  %v73_v33 = vsel %vm57_vm0, %v69_v31, 0.0 }
  0x9e   :  { %71 = vadd.xlane.f32.xlu0 %v70_v30  ;;  %37 = vadd.xlane.f32.xlu1 %v36_v32 }
  0xa2   :  { %74 = vadd.xlane.f32.xlu1 %v73_v33 }
 0x127   :  { %v35_v34 = vpop.xlane.xlu0 %34 }
 0x128   :  { %v39_v35 = vmul.f32 0.003921569, %v35_v34 }
 0x12a   :  { %114 = vrsqrt.f32 %v39_v35  ;;  %vm43_vm1 = vcmp.eq.f32.partialorder %v39_v35, inf  ;;  %v46_v44 = vand.u32 2147483648, %v39_v35  ;;  %vm45_vm2 = vcmp.eq.f32.partialorder %v39_v35, 0.0 }
 0x12b   :  { %v38_v36 = vpop.xlane.xlu1 %37  ;;  %v72_v37 = vpop.xlane.xlu0 %71 }
 0x12c   :  { %v40_v38 = vmul.f32 0.003921569, %v38_v36  ;;  %v76_v39 = vmul.f32 0.015873017, %v72_v37 }
 0x12e   :  { %116 = vrsqrt.f32 %v40_v38  ;;  %vm50_vm3 = vcmp.eq.f32.partialorder %v40_v38, inf  ;;  %v53_v51 = vand.u32 2147483648, %v40_v38  ;;  %vm52_vm4 = vcmp.eq.f32.partialorder %v40_v38, 0.0 }
 0x12f   :  { %118 = vrsqrt.f32 %v76_v39  ;;  %v75_v40 = vpop.xlane.xlu1 %74  ;;  %vm80_vm5 = vcmp.eq.f32.partialorder %v76_v39, inf  ;;  %v83_v59 = vand.u32 2147483648, %v76_v39  ;;  %vm82_vm6 = vcmp.eq.f32.partialorder %v76_v39, 0.0 }
 0x130   :  { %v77_v41 = vmul.f32 0.015873017, %v75_v40 }
 0x132   :  { %120 = vrsqrt.f32 %v77_v41  ;;  %vm87_vm7 = vcmp.eq.f32.partialorder %v77_v41, inf  ;;  %v90_v62 = vand.u32 2147483648, %v77_v41  ;;  %vm89_vm8 = vcmp.eq.f32.partialorder %v77_v41, 0.0 }
 0x134   :  { %v115_v42 = vpop.eup %114 }
 0x135   :  { %v42_v43 = vmul.f32 %v115_v42, %v39_v35 }
 0x137   :  { %v44_v45 = vsel %vm43_vm1, %v39_v35, %v42_v43 }
 0x138   :  { %v117_v46 = vpop.eup %116  ;;  %v47_v47 = vsel %vm45_vm2, %v46_v44, %v44_v45 }
 0x139   :  { %v119_v48 = vpop.eup %118  ;;  %v55_v49 = vadd.f32 1e-05, %v47_v47  ;;  %v49_v50 = vmul.f32 %v117_v46, %v40_v38 }
 0x13a   :  { %v79_v52 = vmul.f32 %v119_v48, %v76_v39 }
 0x13b   :  { %122 = vrcp.f32 %v55_v49  ;;  %v51_v53 = vsel %vm50_vm3, %v40_v38, %v49_v50 }
 0x13c   :  { %v121_v54 = vpop.eup %120  ;;  %v54_v55 = vsel %vm52_vm4, %v53_v51, %v51_v53  ;;  %v81_v57 = vsel %vm80_vm5, %v76_v39, %v79_v52 }
 0x13d   :  { %v56_v56 = vadd.f32 1e-05, %v54_v55  ;;  %v86_v58 = vmul.f32 %v121_v54, %v77_v41  ;;  %v84_v60 = vsel %vm82_vm6, %v83_v59, %v81_v57 }
 0x13e   :  { %v92_v63 = vadd.f32 1e-05, %v84_v60 }
 0x13f   :  { %124 = vrcp.f32 %v56_v56  ;;  %v88_v61 = vsel %vm87_vm7, %v77_v41, %v86_v58 }
 0x140   :  { %v91_v1 = vsel %vm89_vm8, %v90_v62, %v88_v61 }
 0x141   :  { %v93_v5 = vadd.f32 1e-05, %v91_v1 }
 0x145   :  { %v123_v0 = vpop.eup %122 }
 0x146   :  { %v96_v2 = vmul.f32 %v123_v0, %v92_v63 }
 0x148   :  { %v98_v3 = vmul.f32 %v96_v2, %v163_v14  ;;  %v99_v4 = vmul.f32 %v96_v2, %v165_v15 }
 0x149   :  { %v125_v6 = vpop.eup %124 }
 0x14a   :  { %v102_v7 = vadd.f32 %v98_v3, %v161_v13  ;;  %v103_v8 = vadd.f32 %v99_v4, %v161_v13  ;;  %v97_v9 = vmul.f32 %v125_v6, %v93_v5 }
 0x14c   :  { %106 = vst [vmem:[%s207_s2] sm:$0xff] %v102_v7  ;;  %107 = vst [vmem:[%s207_s2 + $0x8] sm:$0xff] %v103_v8  ;;  %v100_v10 = vmul.f32 %v97_v9, %v174_v24  ;;  %v101_v11 = vmul.f32 %v97_v9, %v176_v25 }
 0x14e   :  { %v104_v12 = vadd.f32 %v100_v10, %v168_v20  ;;  %v105_v14 = vadd.f32 %v101_v11, %v168_v20 }
 0x150   :  { %108 = vst [vmem:[%s207_s2 + $0x10] sm:$0xff] %v104_v12  ;;  %109 = vst [vmem:[%s207_s2 + $0x18] sm:$0xff] %v105_v14 }

</bundles_post_ra>
